<compile_context>
chip_gen: v7x
topology: tpu7x:2x2x1
jax: 0.10.0
libtpu: 0.0.40
codegen_flags: <defaults>
</compile_context>

<pallas_src>
import functools

import jax
import jax.numpy as jnp
from jax.experimental import pallas as pl
from jax.experimental.pallas import tpu as pltpu


def _vmem_capacity_bytes():
    """Physical VMEM per core; chip-aware fallback (64 MiB only for v7x)."""
    try:
        info = pltpu.get_tpu_info()
        cap = getattr(info, "vmem_capacity_bytes", None)
        if cap:
            return int(cap)
    except Exception:
        pass
    try:
        kind = jax.devices()[0].device_kind.lower()
        if "v7" not in kind:
            return 128 << 20          # v2..v6e all have 128 MiB per core
    except Exception:
        pass
    return 64 << 20                   # conservative: v7x per-TensorCore VMEM


def _dice_partial_kernel(pred_ref, targ_ref, inter_ref, ptsum_ref, *,
                         s, ts, kt_half, ragged):
    sp = pl.program_id(0)             # spatial split      ("parallel")
    k = pl.program_id(2)              # spatial reduction   ("arbitrary", innermost)

    @pl.when(k == 0)
    def _init():
        inter_ref[...] = jnp.zeros_like(inter_ref)
        ptsum_ref[...] = jnp.zeros_like(ptsum_ref)

    gb = sp * kt_half + k             # unclamped global spatial block index

    def _accumulate(mask_lanes):
        x = pred_ref[...].astype(jnp.float32)
        y = targ_ref[...].astype(jnp.float32)
        if mask_lanes:
            # Zero lanes beyond the true spatial extent.  Also neutralizes the
            # duplicated (index-clamped) block that split 1 re-reads when the
            # total spatial block count is odd.
            lane = jax.lax.broadcasted_iota(jnp.int32, x.shape, 1)
            valid = (lane + gb * ts) < s
            x = jnp.where(valid, x, 0.0)
            y = jnp.where(valid, y, 0.0)
        inter_ref[...] += jnp.sum(x * y, axis=1, keepdims=True)
        # Denominator only ever needs pred_sum + target_sum -> fuse into one
        # accumulator / one cross-lane reduce.
        ptsum_ref[...] += jnp.sum(x + y, axis=1, keepdims=True)

    if ragged:
        is_edge = (gb + 1) * ts > s   # only tiles passing the true end

        @pl.when(is_edge)
        def _edge_tile():
            _accumulate(True)

        @pl.when(jnp.logical_not(is_edge))
        def _body_tile():
            _accumulate(False)
    else:
        _accumulate(False)


def dice_loss(pred, target, smooth=1e-6, spatial_tile=None):
    assert pred.shape == target.shape and pred.ndim == 5
    n, c, d, h, w = pred.shape
    nc = n * c
    s = d * h * w

    pred2 = pred.reshape(nc, s)
    targ2 = target.reshape(nc, s)

    # Row block: fixed multiple of 8 (<= 512); only fall back to the full
    # extent when nc < 8 (full-dim blocks are exempt from the (8,128) rule).
    # Ragged row blocks rely on clamped reads / dropped OOB-row writes, which
    # is safe because the reduction never mixes rows.
    if nc < 8:
        rb = nc
    else:
        rb = 8 * min(64, nc // 8)
    row_blocks = pl.cdiv(nc, rb)

    # Spatial tile: multiple of 128 lanes; per-input-block cap is generation
    # aware (16 MiB on 128-MiB-VMEM chips, 8 MiB on v7x) so the 2-input x
    # 2-buffer pipeline always fits with headroom.
    cap = _vmem_capacity_bytes()
    budget = (3 * cap) // 5
    per_block_cap = (16 << 20) if cap >= (128 << 20) else (8 << 20)
    bpe = max(jnp.dtype(pred2.dtype).itemsize, jnp.dtype(targ2.dtype).itemsize)

    s_rounded = ((s + 127) // 128) * 128
    ts = min(budget // (4 * rb * bpe), per_block_cap // (rb * bpe), s_rounded)
    if spatial_tile is not None:
        ts = min(ts, ((int(spatial_tile) + 127) // 128) * 128)
    ts = max(128, (ts // 128) * 128)

    kt_total = pl.cdiv(s, ts)

    # v7x megacore: if the row axis has a single block (typical tiny N*C),
    # split the spatial reduction into two halves so both TensorCores each
    # stream half of HBM; the wrapper sums the per-split partials.
    if row_blocks == 1 and kt_total >= 2:
        num_splits = 2
        kt_half = (kt_total + 1) // 2
    else:
        num_splits = 1
        kt_half = kt_total

    # Any tile whose unclamped extent passes the true spatial end needs the
    # lane mask (ragged last tile, or the clamped duplicate when kt is odd).
    ragged = (num_splits * kt_half * ts) > s

    if num_splits * kt_half > kt_total:
        # Keep every DMA in bounds: split 1's final block index is clamped to
        # the last real block; its contribution is masked to zero in-kernel.
        def spatial_block(sp, k):
            return jnp.minimum(sp * kt_half + k, kt_total - 1)
    else:
        def spatial_block(sp, k):
            return sp * kt_half + k

    grid = (num_splits, row_blocks, kt_half)

    pipelined_bytes = 4 * rb * ts * bpe          # 2 inputs x 2 pipeline buffers
    vmem_limit = int(min(max(pipelined_bytes + (8 << 20), 32 << 20),
                         cap - (8 << 20)))

    kernel = functools.partial(_dice_partial_kernel, s=s, ts=ts,
                               kt_half=kt_half, ragged=ragged)

    cost = pl.CostEstimate(
        flops=4 * nc * s,
        transcendentals=0,
        bytes_accessed=nc * s * (jnp.dtype(pred2.dtype).itemsize
                                 + jnp.dtype(targ2.dtype).itemsize)
        + 2 * num_splits * nc * 4,
    )

    inter, ptsum = pl.pallas_call(
        kernel,
        out_shape=(
            jax.ShapeDtypeStruct((num_splits, nc, 1), jnp.float32),
            jax.ShapeDtypeStruct((num_splits, nc, 1), jnp.float32),
        ),
        grid_spec=pltpu.PrefetchScalarGridSpec(
            num_scalar_prefetch=0,
            grid=grid,
            in_specs=[
                pl.BlockSpec((rb, ts),
                             lambda sp, r, k: (r, spatial_block(sp, k))),
                pl.BlockSpec((rb, ts),
                             lambda sp, r, k: (r, spatial_block(sp, k))),
            ],
            out_specs=[
                pl.BlockSpec((None, rb, 1), lambda sp, r, k: (sp, r, 0)),
                pl.BlockSpec((None, rb, 1), lambda sp, r, k: (sp, r, 0)),
            ],
        ),
        compiler_params=pltpu.CompilerParams(
            dimension_semantics=("parallel", "parallel", "arbitrary"),
            vmem_limit_bytes=vmem_limit,
        ),
        cost_estimate=cost,
    )(pred2, targ2)

    inter = jnp.sum(inter, axis=0)[:, 0]         # (nc,)
    ptsum = jnp.sum(ptsum, axis=0)[:, 0]
    dice = (2.0 * inter + smooth) / (ptsum + smooth)
    # mean over channels then over batch == mean over all (n, c) rows, since
    # every batch element has the same number of channels.
    return jnp.mean(1.0 - dice)


def dice_loss_ref(pred, target, smooth=1e-6):
    inter = jnp.sum(pred * target, axis=(2, 3, 4))
    ps = jnp.sum(pred, axis=(2, 3, 4))
    ts_ = jnp.sum(target, axis=(2, 3, 4))
    dice = (2.0 * inter + smooth) / (ps + ts_ + smooth)
    return jnp.mean(jnp.mean(1.0 - dice, axis=1))


def _check(pred, target, **kw):
    out = jax.block_until_ready(dice_loss(pred, target, **kw))
    ref = jax.block_until_ready(dice_loss_ref(pred, target))
    assert jnp.allclose(out, ref, rtol=1e-5, atol=1e-6), (out, ref, kw)


if __name__ == "__main__":
    key = jax.random.PRNGKey(0)

    # Case 1: small aligned 5D volume (N, C, D, H, W), single tile.
    k1, k2, k3, k4, k5, k6 = jax.random.split(key, 6)
    pred = jax.nn.sigmoid(jax.random.normal(k1, (2, 4, 8, 16, 16), jnp.float32))
    target = (jax.random.uniform(k2, (2, 4, 8, 16, 16)) > 0.5).astype(jnp.float32)
    _check(pred, target)

    # Case 2: odd shapes -> ragged lane mask and nc < 8 (full-dim row block).
    pred_b = jax.nn.sigmoid(jax.random.normal(k3, (2, 3, 7, 9, 11), jnp.float32))
    target_b = (jax.random.uniform(k4, (2, 3, 7, 9, 11)) > 0.5).astype(jnp.float32)
    _check(pred_b, target_b)

    # Case 3: force multiple spatial tiles -> exercises the 2-way spatial
    # split (even block count, no clamped duplicate).
    _check(pred, target, spatial_tile=384)

    # Case 4: odd spatial block count with the 2-way split -> exercises the
    # clamped duplicate block that is masked to zero in-kernel.
    _check(pred, target, spatial_tile=768)

    # Case 5: nc = 15 (>= 8, not a multiple of rb) -> ragged row block path
    # (OOB input rows are garbage, OOB output-row writes dropped).
    pred_c = jax.nn.sigmoid(jax.random.normal(k5, (3, 5, 4, 8, 8), jnp.float32))
    target_c = (jax.random.uniform(k6, (3, 5, 4, 8, 8)) > 0.5).astype(jnp.float32)
    _check(pred_c, target_c, spatial_tile=128)

    print("KERNEL_OK")
</pallas_src>

<mosaic_0001>
module attributes {stable_mosaic.version = 11 : i64} {
  func.func @_dice_partial_kernel(%arg0: i32, %arg1: i32, %arg2: i32, %arg3: memref<8x2048xf32, #tpu.memory_space<vmem>>, %arg4: memref<8x2048xf32, #tpu.memory_space<vmem>>, %arg5: memref<1x8x1xf32, #tpu.memory_space<vmem>>, %arg6: memref<1x8x1xf32, #tpu.memory_space<vmem>>) attributes {dimension_semantics = [#tpu.dimension_semantics<parallel>, #tpu.dimension_semantics<parallel>, #tpu.dimension_semantics<arbitrary>], iteration_bounds = array<i64: 1, 1, 1>, scalar_prefetch = 0 : i64, scratch_operands = 0 : i64, tpu.core_type = #tpu.core_type<tc>, window_params = [{transform_indices = @transform_0, window_bounds = array<i64: 8, 2048>}, {transform_indices = @transform_1, window_bounds = array<i64: 8, 2048>}, {transform_indices = @transform_2, window_bounds = array<i64: 1, 8, 1>}, {transform_indices = @transform_3, window_bounds = array<i64: 1, 8, 1>}]} {
    %c0_i32 = arith.constant 0 : i32
    %0 = arith.cmpi eq, %arg2, %c0_i32 : i32
    %1 = arith.extui %0 : i1 to i32
    %c0_i32_0 = arith.constant 0 : i32
    %2 = arith.cmpi ne, %1, %c0_i32_0 : i32
    scf.if %2 {
      %cst_17 = arith.constant 0.000000e+00 : f32
      %23 = vector.broadcast %cst_17 : f32 to vector<8x1xf32>
      %c0_18 = arith.constant 0 : index
      %c0_19 = arith.constant 0 : index
      %c0_20 = arith.constant 0 : index
      %24 = vector.load %arg5[%c0_18, %c0_19, %c0_20] : memref<1x8x1xf32, #tpu.memory_space<vmem>>, vector<1x8x1xf32>
      %25 = vector.shape_cast %24 : vector<1x8x1xf32> to vector<8x1xf32>
      %26 = vector.shape_cast %23 : vector<8x1xf32> to vector<1x8x1xf32>
      tpu.vector_store %arg5[%c0_18, %c0_19, %c0_20], %26 {strides = array<i32>} : memref<1x8x1xf32, #tpu.memory_space<vmem>>, vector<1x8x1xf32>,
      %cst_21 = arith.constant 0.000000e+00 : f32
      %27 = vector.broadcast %cst_21 : f32 to vector<8x1xf32>
      %c0_22 = arith.constant 0 : index
      %c0_23 = arith.constant 0 : index
      %c0_24 = arith.constant 0 : index
      %28 = vector.load %arg6[%c0_22, %c0_23, %c0_24] : memref<1x8x1xf32, #tpu.memory_space<vmem>>, vector<1x8x1xf32>
      %29 = vector.shape_cast %28 : vector<1x8x1xf32> to vector<8x1xf32>
      %30 = vector.shape_cast %27 : vector<8x1xf32> to vector<1x8x1xf32>
      tpu.vector_store %arg6[%c0_22, %c0_23, %c0_24], %30 {strides = array<i32>} : memref<1x8x1xf32, #tpu.memory_space<vmem>>, vector<1x8x1xf32>,
    } else {
    }
    %c0 = arith.constant 0 : index
    %c0_1 = arith.constant 0 : index
    %3 = vector.load %arg3[%c0, %c0_1] : memref<8x2048xf32, #tpu.memory_space<vmem>>, vector<8x2048xf32>
    %c0_2 = arith.constant 0 : index
    %c0_3 = arith.constant 0 : index
    %4 = vector.load %arg4[%c0_2, %c0_3] : memref<8x2048xf32, #tpu.memory_space<vmem>>, vector<8x2048xf32>
    %c0_4 = arith.constant 0 : index
    %c0_5 = arith.constant 0 : index
    %c0_6 = arith.constant 0 : index
    %5 = vector.load %arg5[%c0_4, %c0_5, %c0_6] : memref<1x8x1xf32, #tpu.memory_space<vmem>>, vector<1x8x1xf32>
    %6 = vector.shape_cast %5 : vector<1x8x1xf32> to vector<8x1xf32>
    %7 = arith.mulf %3, %4 : vector<8x2048xf32>
    %cst = arith.constant dense<0.000000e+00> : vector<8xf32>
    %8 = vector.multi_reduction <add>, %7, %cst [1] : vector<8x2048xf32> to vector<8xf32>
    %9 = vector.shape_cast %8 : vector<8xf32> to vector<8x1xf32>
    %10 = arith.addf %6, %9 : vector<8x1xf32>
    %c0_7 = arith.constant 0 : index
    %c0_8 = arith.constant 0 : index
    %c0_9 = arith.constant 0 : index
    %11 = vector.load %arg5[%c0_7, %c0_8, %c0_9] : memref<1x8x1xf32, #tpu.memory_space<vmem>>, vector<1x8x1xf32>
    %12 = vector.shape_cast %11 : vector<1x8x1xf32> to vector<8x1xf32>
    %13 = vector.shape_cast %10 : vector<8x1xf32> to vector<1x8x1xf32>
    tpu.vector_store %arg5[%c0_7, %c0_8, %c0_9], %13 {strides = array<i32>} : memref<1x8x1xf32, #tpu.memory_space<vmem>>, vector<1x8x1xf32>,
    %c0_10 = arith.constant 0 : index
    %c0_11 = arith.constant 0 : index
    %c0_12 = arith.constant 0 : index
    %14 = vector.load %arg6[%c0_10, %c0_11, %c0_12] : memref<1x8x1xf32, #tpu.memory_space<vmem>>, vector<1x8x1xf32>
    %15 = vector.shape_cast %14 : vector<1x8x1xf32> to vector<8x1xf32>
    %16 = arith.addf %3, %4 : vector<8x2048xf32>
    %cst_13 = arith.constant dense<0.000000e+00> : vector<8xf32>
    %17 = vector.multi_reduction <add>, %16, %cst_13 [1] : vector<8x2048xf32> to vector<8xf32>
    %18 = vector.shape_cast %17 : vector<8xf32> to vector<8x1xf32>
    %19 = arith.addf %15, %18 : vector<8x1xf32>
    %c0_14 = arith.constant 0 : index
    %c0_15 = arith.constant 0 : index
    %c0_16 = arith.constant 0 : index
    %20 = vector.load %arg6[%c0_14, %c0_15, %c0_16] : memref<1x8x1xf32, #tpu.memory_space<vmem>>, vector<1x8x1xf32>
    %21 = vector.shape_cast %20 : vector<1x8x1xf32> to vector<8x1xf32>
    %22 = vector.shape_cast %19 : vector<8x1xf32> to vector<1x8x1xf32>
    tpu.vector_store %arg6[%c0_14, %c0_15, %c0_16], %22 {strides = array<i32>} : memref<1x8x1xf32, #tpu.memory_space<vmem>>, vector<1x8x1xf32>,
    return
  }
  func.func @transform_0(%arg0: i32, %arg1: i32, %arg2: i32) -> (i32, i32) {
    %c1_i32 = arith.constant 1 : i32
    %0 = arith.muli %arg0, %c1_i32 : i32
    %1 = arith.addi %0, %arg2 : i32
    %c0_i32 = arith.constant 0 : i32
    return %arg1, %1 : i32, i32
  }
  func.func @transform_1(%arg0: i32, %arg1: i32, %arg2: i32) -> (i32, i32) {
    %c1_i32 = arith.constant 1 : i32
    %0 = arith.muli %arg0, %c1_i32 : i32
    %1 = arith.addi %0, %arg2 : i32
    %c0_i32 = arith.constant 0 : i32
    return %arg1, %1 : i32, i32
  }
  func.func @transform_2(%arg0: i32, %arg1: i32, %arg2: i32) -> (i32, i32, i32) {
    %c0_i32 = arith.constant 0 : i32
    %c0_i32_0 = arith.constant 0 : i32
    return %arg0, %arg1, %c0_i32 : i32, i32, i32
  }
  func.func @transform_3(%arg0: i32, %arg1: i32, %arg2: i32) -> (i32, i32, i32) {
    %c0_i32 = arith.constant 0 : i32
    %c0_i32_0 = arith.constant 0 : i32
    return %arg0, %arg1, %c0_i32 : i32, i32, i32
  }
}

</mosaic_0001>

<bundles_post_ra>
// kernel: tpu_custom_call.1
= control target key start
LH: loop header
LB: loop body
LE: loop exit
PB: predicated region body
PF: predicated region fallthrough
CT: control target
= control target key end

     0   :  { %9 = vsyncpa [#allocation3], 0  ;;  %s291_s0 = inlined_call_operand.hbm [shape: f32[8,2048], index: 0, kind: input, shape index: {}]   ;;  %s292_s1 = inlined_call_operand.hbm [shape: f32[8,2048], index: 1, kind: input, shape index: {}]   ;;  %s293_s2 = inlined_call_operand.vmem [shape: f32[1,8,1], index: 2, kind: output, shape index: {0}]   ;;  %s294_s3 = inlined_call_operand.vmem [shape: f32[1,8,1], index: 3, kind: output, shape index: {1}]  }
   0x1   :  { %10 = vsyncpa [#allocation5], 0  ;;  %s222_s12 = smov [#allocation2]   ;;  %s223_s14 = smov [#allocation4]  }
   0x2   :  { %s21_s13 = sshll.u32 %s222_s12, 4  ;;  %s35_s15 = sshll.u32 %s223_s14, 4  ;;  %s22_s13 = int_to_ptr.vmem [resolvable:$true] %s21_s13  ;;  %s36_s15 = int_to_ptr.vmem [resolvable:$true] %s35_s15 }
   0x3   :  { %s174_s18 = scalar_lea.hbm %s291_s0, 2048 }
   0x4   :  { %p175_p0 = scmp.ne.s32.totalorder %s291_s0, %s174_s18  ;;  %p178_p1 = scmp.lt.u32.totalorder %s174_s18, %s291_s0 }
   0x6   :  { %p180_p2 = pnand %p178_p1, %p175_p0 }
   0x8   :  { %183 = shalt.err (!%p180_p2)
}
   0x9   :  { %s184_s23 = scalar_lea.vmem %s22_s13, 2048  ;;  %p189_p4 = scmp.lt.s32.totalorder %s22_s13, %s22_s13 }
   0xa   :  { %p185_p3 = scmp.ne.s32.totalorder %s22_s13, %s184_s23  ;;  %p190_p5 = scmp.lt.s32.totalorder %s184_s23, %s184_s23 }
   0xc   :  { %p191_p6 = por %p190_p5, %p189_p4 }
   0xe   :  { %p192_p7 = pnand %p191_p6, %p185_p3 }
  0x10   :  { %195 = shalt.err (!%p192_p7)
}
  0x11   :  { %24 = dma.hbm_to_vmem [thread:$0]  %s291_s0, 2048, %s22_s13, [#allocation3]  }
  0x12   :  { %s196_s28 = scalar_lea.hbm %s292_s1, 2048 }
  0x13   :  { %p197_p8 = scmp.ne.s32.totalorder %s292_s1, %s196_s28  ;;  %p200_p9 = scmp.lt.u32.totalorder %s196_s28, %s292_s1 }
  0x15   :  { %p202_p10 = pnand %p200_p9, %p197_p8 }
  0x17   :  { %205 = shalt.err (!%p202_p10)
}
  0x18   :  { %s206_s6 = scalar_lea.vmem %s36_s15, 2048  ;;  %p211_p12 = scmp.lt.s32.totalorder %s36_s15, %s36_s15 }
  0x19   :  { %p207_p11 = scmp.ne.s32.totalorder %s36_s15, %s206_s6  ;;  %p212_p13 = scmp.lt.s32.totalorder %s206_s6, %s206_s6 }
  0x1b   :  { %p213_p0 = por %p212_p13, %p211_p12 }
  0x1d   :  { %p214_p1 = pnand %p213_p0, %p207_p11 }
  0x1f   :  { %217 = shalt.err (!%p214_p1)
}
  0x20   :  { %38 = dma.hbm_to_vmem [thread:$0]  %s292_s1, 2048, %s36_s15, [#allocation5]  }
  0x21   :  { %218 = dma.done.wait [#allocation3], 2048  }
  0x22   :  { %219 = vsyncadd [#allocation3], 4294965248 }
  0x23   :  { %220 = dma.done.wait [#allocation5], 2048  }
  0x24   :  { %221 = vsyncadd [#allocation5], 4294965248  ;;  %vm53_vm0 = vcmask 7168   ;;  %v224_v0 = vmov 0.0   ;;  %v56_v1 = vld [vmem:[#allocation2] sm:$0xff]  ;;  %v57_v2 = vld [vmem:[#allocation2 + $0x8] sm:$0xff] }
  0x25   :  { %54 = vst.msk [vmem:[%s293_s2] sm:$0xff] %vm53_vm0, %v224_v0  ;;  %55 = vst.msk [vmem:[%s294_s3] sm:$0xff] %vm53_vm0, %v224_v0  ;;  %v58_v3 = vld [vmem:[#allocation2 + $0x10] sm:$0xff]  ;;  %v59_v4 = vld [vmem:[#allocation2 + $0x18] sm:$0xff] }
  0x26   :  { %v72_v5 = vld [vmem:[#allocation4] sm:$0xff]  ;;  %v73_v6 = vld [vmem:[#allocation4 + $0x8] sm:$0xff]  ;;  %v74_v7 = vld [vmem:[#allocation4 + $0x10] sm:$0xff] }
  0x27   :  { %v75_v8 = vld [vmem:[#allocation4 + $0x18] sm:$0xff]  ;;  %v89_v9 = vmul.f32 %v72_v5, %v56_v1  ;;  %v90_v10 = vmul.f32 %v73_v6, %v57_v2  ;;  %v60_v11 = vld [vmem:[#allocation2 + $0x20] sm:$0xff]  ;;  %v91_v13 = vmul.f32 %v74_v7, %v58_v3  ;;  %v61_v16 = vld [vmem:[#allocation2 + $0x28] sm:$0xff]  ;;  %v126_v22 = vadd.f32 %v72_v5, %v56_v1 }
  0x28   :  { %v76_v12 = vld [vmem:[#allocation4 + $0x20] sm:$0xff]  ;;  %v92_v14 = vmul.f32 %v75_v8, %v59_v4  ;;  %v77_v17 = vld [vmem:[#allocation4 + $0x28] sm:$0xff]  ;;  %v62_v20 = vld [vmem:[#allocation2 + $0x30] sm:$0xff]  ;;  %v127_v23 = vadd.f32 %v73_v6, %v57_v2  ;;  %v128_v28 = vadd.f32 %v74_v7, %v58_v3  ;;  %v129_v33 = vadd.f32 %v75_v8, %v59_v4 }
  0x29   :  { %v105_v15 = vadd.f32 %v90_v10, %v89_v9  ;;  %v93_v18 = vmul.f32 %v76_v12, %v60_v11  ;;  %v78_v21 = vld [vmem:[#allocation4 + $0x30] sm:$0xff]  ;;  %v94_v24 = vmul.f32 %v77_v17, %v61_v16  ;;  %v63_v26 = vld [vmem:[#allocation2 + $0x38] sm:$0xff]  ;;  %v64_v31 = vld [vmem:[#allocation2 + $0x40] sm:$0xff]  ;;  %v130_v39 = vadd.f32 %v76_v12, %v60_v11 }
  0x2a   :  { %v79_v27 = vld [vmem:[#allocation4 + $0x38] sm:$0xff]  ;;  %v95_v29 = vmul.f32 %v78_v21, %v62_v20  ;;  %v80_v32 = vld [vmem:[#allocation4 + $0x40] sm:$0xff]  ;;  %v142_v34 = vadd.f32 %v127_v23, %v126_v22  ;;  %v65_v37 = vld [vmem:[#allocation2 + $0x48] sm:$0xff]  ;;  %v131_v45 = vadd.f32 %v77_v17, %v61_v16  ;;  %v132_v51 = vadd.f32 %v78_v21, %v62_v20 }
  0x2b   :  { %v106_v19 = vadd.f32 %v105_v15, %v91_v13  ;;  %v96_v35 = vmul.f32 %v79_v27, %v63_v26  ;;  %v81_v38 = vld [vmem:[#allocation4 + $0x48] sm:$0xff]  ;;  %v97_v41 = vmul.f32 %v80_v32, %v64_v31  ;;  %v66_v43 = vld [vmem:[#allocation2 + $0x50] sm:$0xff]  ;;  %v67_v49 = vld [vmem:[#allocation2 + $0x58] sm:$0xff]  ;;  %v133_v57 = vadd.f32 %v79_v27, %v63_v26 }
  0x2c   :  { %v143_v40 = vadd.f32 %v142_v34, %v128_v28  ;;  %v82_v44 = vld [vmem:[#allocation4 + $0x50] sm:$0xff]  ;;  %v98_v47 = vmul.f32 %v81_v38, %v65_v37  ;;  %v83_v50 = vld [vmem:[#allocation4 + $0x58] sm:$0xff]  ;;  %v68_v55 = vld [vmem:[#allocation2 + $0x60] sm:$0xff]  ;;  %v134_v63 = vadd.f32 %v80_v32, %v64_v31  ;;  %v135_v5 = vadd.f32 %v81_v38, %v65_v37 }
  0x2d   :  { %v107_v25 = vadd.f32 %v106_v19, %v92_v14  ;;  %v99_v53 = vmul.f32 %v82_v44, %v66_v43  ;;  %v84_v56 = vld [vmem:[#allocation4 + $0x60] sm:$0xff]  ;;  %v100_v59 = vmul.f32 %v83_v50, %v67_v49  ;;  %v69_v61 = vld [vmem:[#allocation2 + $0x68] sm:$0xff]  ;;  %v70_v3 = vld [vmem:[#allocation2 + $0x70] sm:$0xff]  ;;  %v136_v11 = vadd.f32 %v82_v44, %v66_v43 }
  0x2e   :  { %v144_v46 = vadd.f32 %v143_v40, %v129_v33  ;;  %v85_v62 = vld [vmem:[#allocation4 + $0x68] sm:$0xff]  ;;  %v101_v1 = vmul.f32 %v84_v56, %v68_v55  ;;  %v86_v4 = vld [vmem:[#allocation4 + $0x70] sm:$0xff]  ;;  %v71_v9 = vld [vmem:[#allocation2 + $0x78] sm:$0xff]  ;;  %v137_v15 = vadd.f32 %v83_v50, %v67_v49  ;;  %v138_v19 = vadd.f32 %v84_v56, %v68_v55 }
  0x2f   :  { %v108_v30 = vadd.f32 %v107_v25, %v93_v18  ;;  %v102_v7 = vmul.f32 %v85_v62, %v69_v61  ;;  %v87_v10 = vld [vmem:[#allocation4 + $0x78] sm:$0xff]  ;;  %v103_v13 = vmul.f32 %v86_v4, %v70_v3  ;;  %v139_v22 = vadd.f32 %v85_v62, %v69_v61  ;;  %v88_v31 = vld [vmem:[%s293_s2] sm:$0xff] }
  0x30   :  { %v145_v52 = vadd.f32 %v144_v46, %v130_v39  ;;  %v104_v17 = vmul.f32 %v87_v10, %v71_v9  ;;  %v140_v25 = vadd.f32 %v86_v4, %v70_v3  ;;  %v141_v27 = vadd.f32 %v87_v10, %v71_v9  ;;  %v125_v34 = vld [vmem:[%s294_s3] sm:$0xff] }
  0x31   :  { %v109_v36 = vadd.f32 %v108_v30, %v94_v24 }
  0x32   :  { %v146_v58 = vadd.f32 %v145_v52, %v131_v45 }
  0x33   :  { %v110_v42 = vadd.f32 %v109_v36, %v95_v29 }
  0x34   :  { %v147_v0 = vadd.f32 %v146_v58, %v132_v51 }
  0x35   :  { %v111_v48 = vadd.f32 %v110_v42, %v96_v35 }
  0x36   :  { %v148_v6 = vadd.f32 %v147_v0, %v133_v57 }
  0x37   :  { %v112_v54 = vadd.f32 %v111_v48, %v97_v41 }
  0x38   :  { %v149_v12 = vadd.f32 %v148_v6, %v134_v63 }
  0x39   :  { %v113_v60 = vadd.f32 %v112_v54, %v98_v47 }
  0x3a   :  { %v150_v16 = vadd.f32 %v149_v12, %v135_v5 }
  0x3b   :  { %v114_v2 = vadd.f32 %v113_v60, %v99_v53 }
  0x3c   :  { %v151_v20 = vadd.f32 %v150_v16, %v136_v11 }
  0x3d   :  { %v115_v8 = vadd.f32 %v114_v2, %v100_v59 }
  0x3e   :  { %v152_v23 = vadd.f32 %v151_v20, %v137_v15 }
  0x3f   :  { %v116_v14 = vadd.f32 %v115_v8, %v101_v1 }
  0x40   :  { %v153_v26 = vadd.f32 %v152_v23, %v138_v19 }
  0x41   :  { %v117_v18 = vadd.f32 %v116_v14, %v102_v7 }
  0x42   :  { %v154_v28 = vadd.f32 %v153_v26, %v139_v22 }
  0x43   :  { %v118_v21 = vadd.f32 %v117_v18, %v103_v13 }
  0x44   :  { %v155_v29 = vadd.f32 %v154_v28, %v140_v25 }
  0x45   :  { %v119_v24 = vadd.f32 %v118_v21, %v104_v17 }
  0x46   :  { %v156_v30 = vadd.f32 %v155_v29, %v141_v27 }
  0x47   :  { %120 = vadd.xlane.f32.xlu0 %v119_v24 }
  0x4b   :  { %157 = vadd.xlane.f32.xlu0 %v156_v30 }
  0xd4   :  { %v121_v32 = vpop.xlane.xlu0 %120 }
  0xd5   :  { %v122_v33 = vadd.f32 %v121_v32, %v88_v31 }
  0xd7   :  { %124 = vst.msk [vmem:[%s293_s2] sm:$0xff] %vm53_vm0, %v122_v33 }
  0xd8   :  { %v158_v35 = vpop.xlane.xlu0 %157 }
  0xd9   :  { %v159_v36 = vadd.f32 %v158_v35, %v125_v34 }
  0xdb   :  { %160 = vst.msk [vmem:[%s294_s3] sm:$0xff] %vm53_vm0, %v159_v36 }
  0xdc   :  { %169 = vsyncpa [#allocation3], 1 }
  0xdd   :  { %170 = vsyncpa [#allocation5], 1 }

</bundles_post_ra>
